<compile_context>
chip_gen: v7x
topology: tpu7x:2x2x1
jax: 0.10.0
libtpu: 0.0.40
codegen_flags: <defaults>
</compile_context>

<pallas_src>
import math

import jax
import jax.numpy as jnp
from jax.experimental import pallas as pl
from jax.experimental.pallas import tpu as pltpu


def _node_apply_kernel(h_ref, w_ref, o_ref):
    # h_ref: (tile, K) caller dtype (f32 here), VMEM, auto double-buffered
    # w_ref: (K, M)    bf16, tiny, resident every step
    # o_ref: (tile, M) bf16
    h = h_ref[...].astype(jnp.bfloat16)   # free VPU cast on a mem-bound op
    acc = jnp.dot(h, w_ref[...], preferred_element_type=jnp.float32)   # MXU
    # Activation == ReLU (module constructed with F.relu), on f32 accumulator.
    o_ref[...] = jnp.maximum(acc, 0.0).astype(o_ref.dtype)


# Double-buffered in/out tiles + resident weight must fit even v5e's 16 MiB
# *default scoped* VMEM (we no longer override vmem_limit_bytes).
_VMEM_TILE_BUDGET = 12 * 1024 * 1024
_MIN_STEP_INPUT_BYTES = 1 << 20   # ~1 MiB/step keeps ~85% of HBM roofline


def _repack_factor(N, in_feats, out_feats, max_r=64):
    """Smallest r making both r*in_feats and r*out_feats multiples of 128
    (lane-dense loads AND stores).  Requires N % r == 0 for the free reshape;
    otherwise fall back to r=1 (block == full dim is still legal)."""
    r_in = 128 // math.gcd(in_feats, 128)
    r_out = 128 // math.gcd(out_feats, 128)
    r = (r_in * r_out) // math.gcd(r_in, r_out)
    if r == 1:
        return 1
    if r <= max_r and N % r == 0:
        return r
    return 1


def _block_diag(w, r):
    in_f, out_f = w.shape
    wb = jnp.zeros((r * in_f, r * out_f), w.dtype)
    for i in range(r):
        wb = wb.at[i * in_f:(i + 1) * in_f, i * out_f:(i + 1) * out_f].set(w)
    return wb


def _pick_tile_rows(n_rows, in_row_bytes, out_row_bytes, w_bytes, max_tile):
    """Largest power-of-two row tile (>=16, multiple of 16 for bf16 sublane
    packing) that fits the VMEM budget; then prefer >= 8 grid steps (>= 4 per
    v7x TensorCore) while each step still moves >= ~1 MiB of input."""
    tile = max(16, min(max_tile, pl.next_power_of_2(max(n_rows, 16))))
    per_row = 2 * (in_row_bytes + out_row_bytes)          # double-buffered
    while tile > 16 and tile * per_row + 2 * w_bytes > _VMEM_TILE_BUDGET:
        tile //= 2
    while (tile > 16 and pl.cdiv(n_rows, tile) < 8
           and (tile // 2) * in_row_bytes >= _MIN_STEP_INPUT_BYTES):
        tile //= 2
    return tile


def node_apply(h, w_t, *, out_dtype=jnp.bfloat16, max_tile_rows=4096):
    """h: (N, in_feats), w_t: (in_feats, out_feats) -> relu(h @ w_t).

    Output is bf16 by default (inference-friendly; matmul accumulates in f32)."""
    N, in_feats = h.shape
    in_feats_w, out_feats = w_t.shape
    assert in_feats_w == in_feats

    r = _repack_factor(N, in_feats, out_feats)
    if r > 1:
        # Free row-major view: 4 consecutive nodes share one lane-dense row.
        h_k = h.reshape(N // r, r * in_feats)
        w_k = _block_diag(w_t, r).astype(jnp.bfloat16)    # (r*in, r*out), tiny
    else:
        h_k = h
        w_k = w_t.astype(jnp.bfloat16)

    n_rows, k_feats = h_k.shape
    m_feats = w_k.shape[1]

    in_row_bytes = k_feats * h_k.dtype.itemsize
    out_row_bytes = m_feats * jnp.dtype(out_dtype).itemsize
    w_bytes = k_feats * m_feats * 2
    tile = _pick_tile_rows(n_rows, in_row_bytes, out_row_bytes, w_bytes,
                           max_tile_rows)

    grid = (pl.cdiv(n_rows, tile),)   # ragged last block masked by Pallas
    out = pl.pallas_call(
        _node_apply_kernel,
        out_shape=jax.ShapeDtypeStruct((n_rows, m_feats), out_dtype),
        grid_spec=pltpu.PrefetchScalarGridSpec(
            num_scalar_prefetch=0,
            grid=grid,
            in_specs=[
                pl.BlockSpec((tile, k_feats), lambda i: (i, 0)),
                # Full weight every step; block == full array dims is legal.
                pl.BlockSpec((k_feats, m_feats), lambda i: (0, 0)),
            ],
            out_specs=pl.BlockSpec((tile, m_feats), lambda i: (i, 0)),
        ),
        compiler_params=pltpu.CompilerParams(
            dimension_semantics=("parallel",),
            # No vmem_limit override: tiles fit the default scoped VMEM on
            # every generation (v5e 16 MiB .. v7x 32 MiB), leaving headroom.
        ),
    )(h_k, w_k)

    # Free view back to (N, out_feats).
    return out.reshape(N, out_feats)


if __name__ == "__main__":
    # Small, module-consistent shapes: N nodes, in_feats -> out_feats.
    N, in_feats, out_feats = 128, 64, 32

    key = jax.random.PRNGKey(0)
    k_h, k_w = jax.random.split(key)

    # node.data['h']
    h = jax.random.normal(k_h, (N, in_feats), dtype=jnp.float32)

    # Deterministic Linear weight (PyTorch shape (out_feats, in_feats)),
    # stored transposed for the kernel.
    w = jax.random.uniform(
        k_w, (out_feats, in_feats), dtype=jnp.float32,
        minval=-1.0 / jnp.sqrt(in_feats), maxval=1.0 / jnp.sqrt(in_feats))
    w_t = w.T  # (in_feats, out_feats)

    out = node_apply(h, w_t)
    out = jax.block_until_ready(out)

    # Reference check against plain JAX (Linear no-bias + ReLU); bf16-matmul
    # tolerance (f32 accumulation inside the kernel).
    ref = jnp.maximum(h @ w_t, 0.0)
    assert out.shape == (N, out_feats)
    assert jnp.allclose(out.astype(jnp.float32), ref, atol=5e-2, rtol=5e-2)

    print("KERNEL_OK")
</pallas_src>

<mosaic_0001>
module attributes {stable_mosaic.version = 11 : i64} {
  func.func @_node_apply_kernel(%arg0: i32, %arg1: memref<32x256xf32, #tpu.memory_space<vmem>>, %arg2: memref<256x128xbf16, #tpu.memory_space<vmem>>, %arg3: memref<32x128xbf16, #tpu.memory_space<vmem>>) attributes {dimension_semantics = [#tpu.dimension_semantics<parallel>], iteration_bounds = array<i64: 1>, scalar_prefetch = 0 : i64, scratch_operands = 0 : i64, tpu.core_type = #tpu.core_type<tc>, window_params = [{transform_indices = @transform_0, window_bounds = array<i64: 32, 256>}, {pipeline_mode = #tpu.pipeline_mode<synchronous>, transform_indices = @transform_1, window_bounds = array<i64: 256, 128>}, {transform_indices = @transform_2, window_bounds = array<i64: 32, 128>}]} {
    %c0 = arith.constant 0 : index
    %c0_0 = arith.constant 0 : index
    %0 = vector.load %arg1[%c0, %c0_0] : memref<32x256xf32, #tpu.memory_space<vmem>>, vector<32x256xf32>
    %1 = arith.truncf %0 : vector<32x256xf32> to vector<32x256xbf16>
    %c0_1 = arith.constant 0 : index
    %c0_2 = arith.constant 0 : index
    %2 = vector.load %arg2[%c0_1, %c0_2] : memref<256x128xbf16, #tpu.memory_space<vmem>>, vector<256x128xbf16>
    %cst = arith.constant dense<0.000000e+00> : vector<32x128xf32>
    %3 = tpu.matmul %1, %2, %cst {dimension_numbers = #tpu.dot_dimension_numbers<[1], [0], [0], [1], [0, 0, 1, 1], [], []>} : vector<32x256xbf16>, vector<256x128xbf16>, vector<32x128xf32> -> vector<32x128xf32>
    %cst_3 = arith.constant 0.000000e+00 : f32
    %4 = vector.broadcast %cst_3 : f32 to vector<32x128xf32>
    %5 = arith.maximumf %3, %4 : vector<32x128xf32>
    %6 = arith.truncf %5 : vector<32x128xf32> to vector<32x128xbf16>
    %c0_4 = arith.constant 0 : index
    %c0_5 = arith.constant 0 : index
    %7 = vector.load %arg3[%c0_4, %c0_5] : memref<32x128xbf16, #tpu.memory_space<vmem>>, vector<32x128xbf16>
    tpu.vector_store %arg3[%c0_4, %c0_5], %6 {strides = array<i32>} : memref<32x128xbf16, #tpu.memory_space<vmem>>, vector<32x128xbf16>,
    return
  }
  func.func @transform_0(%arg0: i32) -> (i32, i32) {
    %c0_i32 = arith.constant 0 : i32
    %c0_i32_0 = arith.constant 0 : i32
    return %arg0, %c0_i32 : i32, i32
  }
  func.func @transform_1(%arg0: i32) -> (i32, i32) {
    %c0_i32 = arith.constant 0 : i32
    %c0_i32_0 = arith.constant 0 : i32
    %c0_i32_1 = arith.constant 0 : i32
    return %c0_i32, %c0_i32_0 : i32, i32
  }
  func.func @transform_2(%arg0: i32) -> (i32, i32) {
    %c0_i32 = arith.constant 0 : i32
    %c0_i32_0 = arith.constant 0 : i32
    return %arg0, %c0_i32 : i32, i32
  }
}

</mosaic_0001>

<bundles_post_ra>
// kernel: tpu_custom_call.1
= control target key start
LH: loop header
LB: loop body
LE: loop exit
PB: predicated region body
PF: predicated region fallthrough
CT: control target
= control target key end

     0   :  { %7 = vsyncpa [#allocation3], 0  ;;  %s510_s0 = inlined_call_operand.hbm [shape: f32[32,256], index: 0, kind: input, shape index: {}]   ;;  %s511_s1 = inlined_call_operand.hbm [shape: bf16[256,128], index: 1, kind: input, shape index: {}]   ;;  %s512_s2 = inlined_call_operand.hbm [shape: bf16[32,128], index: 2, kind: output, shape index: {}]  }
   0x1   :  { %8 = vsyncpa [#allocation6], 0 }
   0x2   :  { %9 = vsyncpa [#allocation4], 0  ;;  %s446_s9 = smov [#allocation2]   ;;  %s374_s13 = scalar_lea.hbm %s510_s0, 1024 }
   0x3   :  { %s15_s10 = sshll.u32 %s446_s9, 4  ;;  %p375_p0 = scmp.ne.s32.totalorder %s510_s0, %s374_s13  ;;  %s16_s10 = int_to_ptr.vmem [resolvable:$true] %s15_s10 }
   0x4   :  { %p378_p1 = scmp.lt.u32.totalorder %s374_s13, %s510_s0 }
   0x6   :  { %p380_p2 = pnand %p378_p1, %p375_p0 }
   0x8   :  { %383 = shalt.err (!%p380_p2)
}
   0x9   :  { %s384_s18 = scalar_lea.vmem %s16_s10, 1024  ;;  %p389_p4 = scmp.lt.s32.totalorder %s16_s10, %s16_s10 }
   0xa   :  { %p385_p3 = scmp.ne.s32.totalorder %s16_s10, %s384_s18  ;;  %p390_p5 = scmp.lt.s32.totalorder %s384_s18, %s384_s18 }
   0xc   :  { %p391_p6 = por %p390_p5, %p389_p4 }
   0xe   :  { %p392_p7 = pnand %p391_p6, %p385_p3 }
  0x10   :  { %395 = shalt.err (!%p392_p7)
}
  0x11   :  { %s447_s19 = smov 256   ;;  %s448_s20 = smov 16  }
  0x12   :  { %21 = dma.hbm_to_vmem [thread:$0]  %s510_s0, 1024, %s16_s10, [#allocation3], %s447_s19, %s447_s19, %s448_s20  }
  0x13   :  { %s449_s23 = smov [#allocation5]   ;;  %s396_s27 = scalar_lea.hbm %s511_s1, 2048 }
  0x14   :  { %s27_s24 = sshll.u32 %s449_s23, 4  ;;  %p397_p8 = scmp.ne.s32.totalorder %s511_s1, %s396_s27  ;;  %s28_s24 = int_to_ptr.vmem [resolvable:$true] %s27_s24 }
  0x15   :  { %p400_p9 = scmp.lt.u32.totalorder %s396_s27, %s511_s1 }
  0x17   :  { %p402_p10 = pnand %p400_p9, %p397_p8 }
  0x19   :  { %405 = shalt.err (!%p402_p10)
}
  0x1a   :  { %s406_s4 = scalar_lea.vmem %s28_s24, 2048  ;;  %p411_p12 = scmp.lt.s32.totalorder %s28_s24, %s28_s24 }
  0x1b   :  { %p407_p11 = scmp.ne.s32.totalorder %s28_s24, %s406_s4  ;;  %p412_p13 = scmp.lt.s32.totalorder %s406_s4, %s406_s4 }
  0x1d   :  { %p413_p0 = por %p412_p13, %p411_p12 }
  0x1f   :  { %p414_p1 = pnand %p413_p0, %p407_p11 }
  0x21   :  { %417 = shalt.err (!%p414_p1)
}
  0x22   :  { %s450_s0 = smov 64   ;;  %s451_s5 = smov 4  }
  0x23   :  { %33 = dma.hbm_to_vmem [thread:$0]  %s511_s1, 2048, %s28_s24, [#allocation6], %s450_s0, %s450_s0, %s451_s5  }
  0x24   :  { %440 = dma.done.wait [#allocation3], 1024  }
  0x25   :  { %441 = vsyncadd [#allocation3], 4294966272 }
  0x26   :  { %442 = dma.done.wait [#allocation6], 2048  }
  0x27   :  { %443 = vsyncadd [#allocation6], 4294965248  ;;  %v358_v0 = vld [vmem:[#allocation5 + $0x40] sm:$0xff]   ;;  %v360_v2 = vld [vmem:[#allocation5 + $0x48] sm:$0xff]   ;;  %s452_s1 = smov [#allocation7]  }
  0x28   :  { %v359_v1 = vld [vmem:[#allocation5] sm:$0xff]   ;;  %307 = vmatprep.subr.bf16.mxu0 %v358_v0  ;;  %335 = vmatprep.subr.bf16.mxu1 %v358_v0  ;;  %v361_v3 = vld [vmem:[#allocation5 + $0x8] sm:$0xff]   ;;  %v362_v4 = vld [vmem:[#allocation5 + $0x50] sm:$0xff]   ;;  %s259_s8 = sshll.u32 %s452_s1, 4  ;;  %s260_s8 = int_to_ptr.vmem [resolvable:$true] %s259_s8 }
  0x29   :  { %308 = vmatpush3.bf16.msra.mxu0 %v359_v1  ;;  %343 = vmatpush3.bf16.msra.mxu1 %v359_v1  ;;  %v363_v5 = vld [vmem:[#allocation5 + $0x10] sm:$0xff]   ;;  %v364_v6 = vld [vmem:[#allocation5 + $0x58] sm:$0xff]   ;;  %v366_v8 = vld [vmem:[#allocation5 + $0x60] sm:$0xff]   ;;  %s418_s9 = scalar_lea.vmem %s260_s8, 256  ;;  %p423_p3 = scmp.lt.s32.totalorder %s260_s8, %s260_s8 }
  0x2a   :  { %309 = vmatprep.subr.bf16.mxu0 %v360_v2  ;;  %336 = vmatprep.subr.bf16.mxu1 %v360_v2  ;;  %v365_v7 = vld [vmem:[#allocation5 + $0x18] sm:$0xff]   ;;  %v367_v9 = vld [vmem:[#allocation5 + $0x20] sm:$0xff]   ;;  %v368_v10 = vld [vmem:[#allocation5 + $0x68] sm:$0xff]   ;;  %p419_p2 = scmp.ne.s32.totalorder %s260_s8, %s418_s9  ;;  %p424_p4 = scmp.lt.s32.totalorder %s418_s9, %s418_s9 }
  0x2b   :  { %v42_v11 = vld [vmem:[#allocation2 + $0x8] sm:$0xff]  ;;  %v44_v12 = vld [vmem:[#allocation2 + $0x18] sm:$0xff]  ;;  %v370_v18 = vld [vmem:[#allocation5 + $0x70] sm:$0xff]  }
  0x2c   :  { %v46_v13 = vld [vmem:[#allocation2 + $0x28] sm:$0xff]  ;;  %v50_v14 = vpack.c.bf16 %v44_v12, %v42_v11  ;;  %v48_v15 = vld [vmem:[#allocation2 + $0x38] sm:$0xff]  ;;  %v371_v19 = vld [vmem:[#allocation5 + $0x30] sm:$0xff]   ;;  %p425_p5 = por %p424_p4, %p423_p3 }
  0x2d   :  { %310 = vmatpush3.bf16.msra.mxu0 %v361_v3  ;;  %344 = vmatpush3.bf16.msra.mxu1 %v361_v3  ;;  %v52_v16 = vpack.c.bf16 %v48_v15, %v46_v13  ;;  %v369_v17 = vld [vmem:[#allocation5 + $0x28] sm:$0xff]   ;;  %v372_v20 = vld [vmem:[#allocation5 + $0x78] sm:$0xff]   ;;  %v41_v22 = vld [vmem:[#allocation2] sm:$0xff] }
  0x2e   :  { %311 = vmatprep.subr.bf16.mxu0 %v362_v4  ;;  %337 = vmatprep.subr.bf16.mxu1 %v362_v4  ;;  %v373_v21 = vld [vmem:[#allocation5 + $0x38] sm:$0xff]   ;;  %v43_v23 = vld [vmem:[#allocation2 + $0x10] sm:$0xff]  ;;  %v45_v24 = vld [vmem:[#allocation2 + $0x20] sm:$0xff]  ;;  %p426_p6 = pnand %p425_p5, %p419_p2 }
  0x2f   :  { %213 = vmatprep.mubr.bf16.mxu0 %v50_v14  ;;  %221 = vmatprep.mubr.bf16.mxu1 %v52_v16  ;;  %v47_v25 = vld [vmem:[#allocation2 + $0x30] sm:$0xff]  ;;  %v49_v26 = vpack.c.bf16 %v43_v23, %v41_v22 }
  0x30   :  { %v51_v27 = vpack.c.bf16 %v47_v25, %v45_v24 }
  0x31   :  { %312 = vmatpush3.bf16.msra.mxu0 %v363_v5  ;;  %345 = vmatpush3.bf16.msra.mxu1 %v363_v5 }
  0x32   :  { %313 = vmatprep.subr.bf16.mxu0 %v364_v6  ;;  %338 = vmatprep.subr.bf16.mxu1 %v364_v6 }
  0x35   :  { %314 = vmatpush3.bf16.msra.mxu0 %v365_v7  ;;  %346 = vmatpush3.bf16.msra.mxu1 %v365_v7 }
  0x36   :  { %315 = vmatprep.subr.bf16.mxu0 %v366_v8  ;;  %339 = vmatprep.subr.bf16.mxu1 %v366_v8 }
  0x39   :  { %316 = vmatpush3.bf16.msra.mxu0 %v367_v9  ;;  %347 = vmatpush3.bf16.msra.mxu1 %v367_v9 }
  0x3a   :  { %317 = vmatprep.subr.bf16.mxu0 %v368_v10  ;;  %340 = vmatprep.subr.bf16.mxu1 %v368_v10 }
  0x3d   :  { %318 = vmatpush3.bf16.msra.mxu0 %v369_v17  ;;  %348 = vmatpush3.bf16.msra.mxu1 %v369_v17 }
  0x3e   :  { %319 = vmatprep.subr.bf16.mxu0 %v370_v18  ;;  %341 = vmatprep.subr.bf16.mxu1 %v370_v18 }
  0x41   :  { %320 = vmatpush3.bf16.msra.mxu0 %v371_v19  ;;  %349 = vmatpush3.bf16.msra.mxu1 %v371_v19 }
  0x42   :  { %321 = vmatprep.subr.bf16.mxu0 %v372_v20  ;;  %342 = vmatprep.subr.bf16.mxu1 %v372_v20 }
  0x45   :  { %322 = vmatpush3.bf16.msra.mxu0 %v373_v21  ;;  %350 = vmatpush3.bf16.msra.mxu1 %v373_v21 }
  0x48   :  { %214 = vmatmul.mubr.bf16.vlgmr.msra.gmra.mrb[0].mxu0 %v49_v26  ;;  %222 = vmatmul.mubr.bf16.vlgmr.msra.gmra.mrb[0].mxu1 %v51_v27 }
 0x11b   :  { %v323_v28 = vpop.f32.mrb[0].mxu0  ;;  %v329_v29 = vpop.f32.mrb[0].mxu1 }
 0x11c   :  { %v324_v30 = vpop.f32.mrb[1].mxu0  ;;  %v330_v31 = vpop.f32.mrb[1].mxu1 }
 0x11d   :  { %v325_v32 = vadd.f32 %v324_v30, %v323_v28  ;;  %v331_v33 = vadd.f32 %v330_v31, %v329_v29  ;;  %v326_v34 = vpop.f32.mrb[2].mxu0  ;;  %v332_v35 = vpop.f32.mrb[2].mxu1 }
 0x11e   :  { %v327_v36 = vpop.f32.mrb[3].mxu0  ;;  %v333_v37 = vpop.f32.mrb[3].mxu1 }
 0x11f   :  { %v328_v38 = vadd.f32 %v327_v36, %v326_v34  ;;  %v334_v39 = vadd.f32 %v333_v37, %v332_v35  ;;  %v230_v40 = vmax.f32 %v325_v32, 0.0  ;;  %v232_v41 = vmax.f32 %v331_v33, 0.0 }
 0x121   :  { %v231_v42 = vmax.f32 %v328_v38, 0.0  ;;  %v233_v43 = vmax.f32 %v334_v39, 0.0 }
 0x123   :  { %v299_v44 = vpack.c.bf16 %v231_v42, %v230_v40  ;;  %v304_v45 = vpack.c.bf16 %v233_v43, %v232_v41 }
 0x125   :  { %300 = vst [vmem:[#allocation7] sm:$0xff] %v299_v44   ;;  %306 = vst [vmem:[#allocation7 + $0x8] sm:$0xff] %v304_v45  }
 0x126   :  { %429 = shalt.err (!%p426_p6)
}
 0x127   :  { %s430_s12 = scalar_lea.hbm %s512_s2, 256 }
 0x128   :  { %p431_p7 = scmp.ne.s32.totalorder %s512_s2, %s430_s12  ;;  %p434_p8 = scmp.lt.u32.totalorder %s430_s12, %s512_s2 }
 0x12a   :  { %p436_p9 = pnand %p434_p8, %p431_p7 }
 0x12c   :  { %439 = shalt.err (!%p436_p9)
}
 0x12d   :  { %265 = dma.vmem_to_hbm [thread:$0]  %s260_s8, 256, %s512_s2, [#allocation4], %s450_s0, %s450_s0, %s451_s5  }
 0x12e   :  { %444 = dma.done.wait [#allocation4], 256  }
 0x12f   :  { %445 = vsyncadd [#allocation4], 4294967040 }
 0x130   :  { %269 = vsyncpa [#allocation3], 1 }
 0x131   :  { %270 = vsyncpa [#allocation6], 1 }
 0x132   :  { %271 = vsyncpa [#allocation4], 1 }

</bundles_post_ra>
